<compile_context>
chip_gen: v7x
topology: tpu7x:2x2x1
jax: 0.10.0
libtpu: 0.0.40
codegen_flags: <defaults>
</compile_context>

<pallas_src>
import jax
import jax.numpy as jnp
from jax.experimental import pallas as pl
from jax.experimental.pallas import tpu as pltpu


def _round_up(v, m):
    return (v + m - 1) // m * m


def _largest_divisor_leq(n, cap):
    cap = max(1, min(cap, n))
    for d in range(cap, 0, -1):
        if n % d == 0:
            return d
    return 1


def _min_fill(dtype):
    """Finite identity element for max in `dtype` (works for dtypes w/o inf)."""
    if jnp.issubdtype(dtype, jnp.floating):
        return jnp.finfo(dtype).min
    return jnp.iinfo(dtype).min


def _vmem_capacity_bytes():
    try:
        info = pltpu.get_tpu_info()
        cap = getattr(info, "vmem_capacity_bytes", None)
        if cap:
            return int(cap)
    except Exception:
        pass
    return 64 << 20  # conservative fallback: v7x per-TC VMEM


def _make_kernel(tb, c, cr, thw, hw, n_k, fill, acc_dtype):
    n_chunks = thw // 128
    rem = hw - (n_k - 1) * thw  # valid lanes in the final spatial tile (1..thw)

    def accumulate(x_ref, acc_ref, valid):
        # Per-lane running max over lane-aligned 128-wide chunks (VPU only).
        # `valid` is static: fully-OOB chunks are skipped, only the straddling
        # chunk (if any) gets a masked `where`.
        acc = acc_ref[...]
        for j in range(n_chunks):
            lo = j * 128
            if lo >= valid:
                break
            chunk = x_ref[:, :, lo:lo + 128]
            if lo + 128 > valid:
                lane = jax.lax.broadcasted_iota(jnp.int32, chunk.shape, 2)
                chunk = jnp.where(lane < (valid - lo), chunk,
                                  jnp.asarray(fill, dtype=chunk.dtype))
            acc = jnp.maximum(acc, chunk)
        acc_ref[...] = acc

    def kernel(x_ref, w1t_ref, w2t_ref, o_ref, acc_ref):
        # x_ref:   (tb, c, thw)   spatial tile
        # w1t_ref: (c, cr)        fc1 weight, pre-transposed
        # w2t_ref: (cr, c)        fc2 weight, pre-transposed
        # o_ref:   (tb, 1, c)     sigmoid output (block index constant over k)
        # acc_ref: (tb, c, 128)   per-lane running-max accumulator
        k = pl.program_id(1)

        @pl.when(k == 0)
        def _init():
            acc_ref[...] = jnp.full((tb, c, 128), fill, dtype=acc_dtype)

        if rem == thw:
            # HW divides evenly into tiles: never any padding to mask.
            accumulate(x_ref, acc_ref, thw)
        elif n_k == 1:
            # Single (padded) tile: the only step is also the tail step.
            accumulate(x_ref, acc_ref, rem)
        else:
            # Mask only on the final spatial tile; all other steps are plain.
            @pl.when(k < n_k - 1)
            def _full():
                accumulate(x_ref, acc_ref, thw)

            @pl.when(k == n_k - 1)
            def _tail():
                accumulate(x_ref, acc_ref, rem)

        @pl.when(k == n_k - 1)
        def _epilogue():
            # Single cross-lane (XLU) reduce per batch tile.
            pooled = jnp.max(acc_ref[...], axis=-1).astype(jnp.float32)   # (tb, c)

            # fc1 (contraction over C) + ReLU -> MXU (batched over tb rows).
            h = jnp.dot(pooled, w1t_ref[...].astype(jnp.float32),
                        preferred_element_type=jnp.float32)               # (tb, cr)
            h = jnp.maximum(h, 0.0)

            # fc2: contraction dim cr is tiny -> VPU broadcast-MAC (avoids a
            # second MXU push/pop tail in the un-hidden epilogue).
            w2t = w2t_ref[...].astype(jnp.float32)                        # (cr, c)
            out = jnp.sum(h[:, :, None] * w2t[None, :, :], axis=1)        # (tb, c)

            o_ref[...] = jax.nn.sigmoid(out).astype(o_ref.dtype)[:, None, :]

    return kernel


def channel_attention(x, w1, w2, *, max_tile_lanes=8192):
    """x: (B, C, H, W) NCHW.  w1: (C//16, C, 1, 1).  w2: (C, C//16, 1, 1).
    Returns (B, C, 1, 1) sigmoid channel-attention weights."""
    B, C, H, W = x.shape
    Cr = w1.shape[0]
    assert Cr >= 1 and w1.shape == (Cr, C, 1, 1) and w2.shape == (C, Cr, 1, 1)
    HW = H * W
    itemsize = jnp.dtype(x.dtype).itemsize

    fill = _min_fill(x.dtype)

    # Generation-aware per-input-tile byte budget: ~1/6 of VMEM capacity
    # (double-buffered input + acc + weights + outputs + compiler scratch),
    # capped at 16 MiB.  v5e/v6e (128 MiB) -> 16 MiB; v7x (64 MiB/TC) -> ~10 MiB.
    vmem_cap = _vmem_capacity_bytes()
    tile_budget = min(vmem_cap // 6, 16 << 20)

    # Lane-aligned spatial tile (multiple of 128; capped so the per-128-lane
    # chunk loop stays a modest unroll).
    lanes_cap = max(128, (tile_budget // max(1, C * itemsize)) // 128 * 128)
    lanes_cap = min(lanes_cap, max_tile_lanes)
    THW = min(lanes_cap, _round_up(HW, 128))
    n_k = int(pl.cdiv(HW, THW))

    # Adaptive batch tile: fill the remaining budget, keep it a divisor of B
    # (no batch tail), and keep >=2 batch steps so the leading "parallel" axis
    # can still shard across v7x's two TensorCores.
    tb_budget = max(1, tile_budget // max(1, C * THW * itemsize))
    tb_cap = min(tb_budget, max(1, B // 2)) if B >= 2 else 1
    TB = _largest_divisor_leq(B, tb_cap)

    x_flat = x.reshape(B, C, HW)
    w1t = w1.reshape(Cr, C).T  # (C, Cr)
    w2t = w2.reshape(C, Cr).T  # (Cr, C)
    w_itemsize = jnp.dtype(w1t.dtype).itemsize

    kernel = _make_kernel(TB, C, Cr, THW, HW, n_k, fill, x.dtype)

    # VMEM budget: double-buffered input tiles + weights + accumulator + output.
    vmem_need = (2 * TB * C * THW * itemsize        # x tiles (double buffered)
                 + 2 * 2 * C * Cr * w_itemsize      # both weights (buffered)
                 + TB * C * 128 * itemsize          # running-max accumulator
                 + 2 * TB * C * itemsize            # output block
                 + (2 << 20))                       # headroom
    vmem_limit = int(min(max(vmem_need, 4 << 20), vmem_cap * 3 // 4))

    cost = pl.CostEstimate(
        flops=4 * B * C * Cr,                       # two tiny matmuls
        transcendentals=B * C,                      # sigmoid
        bytes_accessed=(B * C * HW * itemsize
                        + 2 * C * Cr * w_itemsize
                        + B * C * itemsize))

    out = pl.pallas_call(
        kernel,
        out_shape=jax.ShapeDtypeStruct((B, 1, C), x.dtype),
        grid_spec=pltpu.PrefetchScalarGridSpec(
            num_scalar_prefetch=0,
            grid=(B // TB, n_k),
            in_specs=[
                pl.BlockSpec((TB, C, THW), lambda b, k: (b, 0, k)),
                pl.BlockSpec((C, Cr), lambda b, k: (0, 0)),
                pl.BlockSpec((Cr, C), lambda b, k: (0, 0)),
            ],
            out_specs=pl.BlockSpec((TB, 1, C), lambda b, k: (b, 0, 0)),
            scratch_shapes=[pltpu.VMEM((TB, C, 128), x.dtype)],
        ),
        compiler_params=pltpu.CompilerParams(
            dimension_semantics=("parallel", "arbitrary"),
            vmem_limit_bytes=vmem_limit),
        cost_estimate=cost,
    )(x_flat, w1t, w2t)

    return out.reshape(B, C, 1, 1)


def reference(x, w1, w2):
    """Plain-JAX reference matching the PyTorch forward exactly."""
    B, C, H, W = x.shape
    Cr = w1.shape[0]
    mp = jnp.max(x.reshape(B, C, H * W), axis=-1)           # (B, C)
    h = jnp.maximum(mp @ w1.reshape(Cr, C).T, 0.0)          # (B, Cr)
    out = h @ w2.reshape(C, Cr).T                           # (B, C)
    return jax.nn.sigmoid(out).reshape(B, C, 1, 1)


if __name__ == "__main__":
    key = jax.random.PRNGKey(0)
    k_x, k_w1, k_w2 = jax.random.split(key, 3)

    # in_planes=64 -> hidden = 64 // 16 = 4 (module hardcodes //16).
    B, C, H, W = 2, 64, 16, 16
    Cr = C // 16

    x = jax.random.normal(k_x, (B, C, H, W), dtype=jnp.float32)
    # Conv2d 1x1 weight shapes: (out, in, 1, 1).
    w1 = jax.random.normal(k_w1, (Cr, C, 1, 1), dtype=jnp.float32) * 0.1
    w2 = jax.random.normal(k_w2, (C, Cr, 1, 1), dtype=jnp.float32) * 0.1

    out = channel_attention(x, w1, w2)
    out = jax.block_until_ready(out)

    ref = reference(x, w1, w2)
    assert out.shape == (B, C, 1, 1), out.shape
    assert jnp.allclose(out, ref, atol=1e-5, rtol=1e-5), "mismatch vs reference"

    print("KERNEL_OK")
</pallas_src>

<mosaic_0001>
module attributes {stable_mosaic.version = 11 : i64} {
  func.func @kernel(%arg0: i32, %arg1: i32, %arg2: memref<1x64x256xf32, #tpu.memory_space<vmem>>, %arg3: memref<64x4xf32, #tpu.memory_space<vmem>>, %arg4: memref<4x64xf32, #tpu.memory_space<vmem>>, %arg5: memref<1x1x64xf32, #tpu.memory_space<vmem>>, %arg6: memref<1x64x128xf32, #tpu.memory_space<vmem>>) attributes {dimension_semantics = [#tpu.dimension_semantics<parallel>, #tpu.dimension_semantics<arbitrary>], iteration_bounds = array<i64: 2, 1>, scalar_prefetch = 0 : i64, scratch_operands = 1 : i64, tpu.core_type = #tpu.core_type<tc>, window_params = [{transform_indices = @transform_0, window_bounds = array<i64: 1, 64, 256>}, {pipeline_mode = #tpu.pipeline_mode<synchronous>, transform_indices = @transform_1, window_bounds = array<i64: 64, 4>}, {pipeline_mode = #tpu.pipeline_mode<synchronous>, transform_indices = @transform_2, window_bounds = array<i64: 4, 64>}, {transform_indices = @transform_3, window_bounds = array<i64: 1, 1, 64>}]} {
    %c0_i32 = arith.constant 0 : i32
    %0 = arith.cmpi eq, %arg1, %c0_i32 : i32
    %1 = arith.extui %0 : i1 to i32
    %c0_i32_0 = arith.constant 0 : i32
    %2 = arith.cmpi ne, %1, %c0_i32_0 : i32
    scf.if %2 {
      %cst = arith.constant -3.40282347E+38 : f32
      %12 = vector.broadcast %cst : f32 to vector<1x64x128xf32>
      %c0_13 = arith.constant 0 : index
      %c0_14 = arith.constant 0 : index
      %c0_15 = arith.constant 0 : index
      %13 = vector.load %arg6[%c0_13, %c0_14, %c0_15] : memref<1x64x128xf32, #tpu.memory_space<vmem>>, vector<1x64x128xf32>
      tpu.vector_store %arg6[%c0_13, %c0_14, %c0_15], %12 {strides = array<i32>} : memref<1x64x128xf32, #tpu.memory_space<vmem>>, vector<1x64x128xf32>,
    } else {
    }
    %c0 = arith.constant 0 : index
    %c0_1 = arith.constant 0 : index
    %c0_2 = arith.constant 0 : index
    %3 = vector.load %arg6[%c0, %c0_1, %c0_2] : memref<1x64x128xf32, #tpu.memory_space<vmem>>, vector<1x64x128xf32>
    %c0_3 = arith.constant 0 : index
    %c0_4 = arith.constant 0 : index
    %c0_5 = arith.constant 0 : index
    %4 = vector.load %arg2[%c0_3, %c0_4, %c0_5] : memref<1x64x256xf32, #tpu.memory_space<vmem>>, vector<1x64x128xf32>
    %5 = arith.maximumf %3, %4 : vector<1x64x128xf32>
    %c0_6 = arith.constant 0 : index
    %c0_7 = arith.constant 0 : index
    %c128 = arith.constant 128 : index
    %6 = vector.load %arg2[%c0_6, %c0_7, %c128] : memref<1x64x256xf32, #tpu.memory_space<vmem>>, vector<1x64x128xf32>
    %7 = arith.maximumf %5, %6 : vector<1x64x128xf32>
    %c0_8 = arith.constant 0 : index
    %c0_9 = arith.constant 0 : index
    %c0_10 = arith.constant 0 : index
    %8 = vector.load %arg6[%c0_8, %c0_9, %c0_10] : memref<1x64x128xf32, #tpu.memory_space<vmem>>, vector<1x64x128xf32>
    tpu.vector_store %arg6[%c0_8, %c0_9, %c0_10], %7 {strides = array<i32>} : memref<1x64x128xf32, #tpu.memory_space<vmem>>, vector<1x64x128xf32>,
    %c0_i32_11 = arith.constant 0 : i32
    %9 = arith.cmpi eq, %arg1, %c0_i32_11 : i32
    %10 = arith.extui %9 : i1 to i32
    %c0_i32_12 = arith.constant 0 : i32
    %11 = arith.cmpi ne, %10, %c0_i32_12 : i32
    scf.if %11 {
      %c0_13 = arith.constant 0 : index
      %c0_14 = arith.constant 0 : index
      %c0_15 = arith.constant 0 : index
      %12 = vector.load %arg6[%c0_13, %c0_14, %c0_15] : memref<1x64x128xf32, #tpu.memory_space<vmem>>, vector<1x64x128xf32>
      %cst = arith.constant dense<0xFF800000> : vector<1x64xf32>
      %13 = vector.multi_reduction <maximumf>, %12, %cst [2] : vector<1x64x128xf32> to vector<1x64xf32>
      %c0_16 = arith.constant 0 : index
      %c0_17 = arith.constant 0 : index
      %14 = vector.load %arg3[%c0_16, %c0_17] : memref<64x4xf32, #tpu.memory_space<vmem>>, vector<64x4xf32>
      %cst_18 = arith.constant dense<0.000000e+00> : vector<1x4xf32>
      %15 = tpu.matmul %13, %14, %cst_18 {dimension_numbers = #tpu.dot_dimension_numbers<[1], [0], [0], [1], [0, 0, 1, 1], [], []>} : vector<1x64xf32>, vector<64x4xf32>, vector<1x4xf32> -> vector<1x4xf32>
      %cst_19 = arith.constant 0.000000e+00 : f32
      %16 = vector.broadcast %cst_19 : f32 to vector<1x4xf32>
      %17 = arith.maximumf %15, %16 : vector<1x4xf32>
      %c0_20 = arith.constant 0 : index
      %c0_21 = arith.constant 0 : index
      %18 = vector.load %arg4[%c0_20, %c0_21] : memref<4x64xf32, #tpu.memory_space<vmem>>, vector<4x64xf32>
      %19 = vector.shape_cast %17 : vector<1x4xf32> to vector<1x4x1xf32>
      %20 = vector.shape_cast %18 : vector<4x64xf32> to vector<1x4x64xf32>
      %21 = vector.broadcast %19 : vector<1x4x1xf32> to vector<1x4x64xf32>
      %22 = arith.mulf %21, %20 : vector<1x4x64xf32>
      %cst_22 = arith.constant dense<0.000000e+00> : vector<1x64xf32>
      %23 = vector.multi_reduction <add>, %22, %cst_22 [1] : vector<1x4x64xf32> to vector<1x64xf32>
      %24 = arith.negf %23 : vector<1x64xf32>
      %25 = math.exp %24 : vector<1x64xf32>
      %cst_23 = arith.constant 1.000000e+00 : f32
      %26 = vector.broadcast %cst_23 : f32 to vector<1x64xf32>
      %27 = arith.addf %26, %25 : vector<1x64xf32>
      %28 = arith.divf %26, %27 : vector<1x64xf32>
      %29 = vector.shape_cast %28 : vector<1x64xf32> to vector<1x1x64xf32>
      %c0_24 = arith.constant 0 : index
      %c0_25 = arith.constant 0 : index
      %c0_26 = arith.constant 0 : index
      %30 = vector.load %arg5[%c0_24, %c0_25, %c0_26] : memref<1x1x64xf32, #tpu.memory_space<vmem>>, vector<1x1x64xf32>
      tpu.vector_store %arg5[%c0_24, %c0_25, %c0_26], %29 {strides = array<i32>} : memref<1x1x64xf32, #tpu.memory_space<vmem>>, vector<1x1x64xf32>,
    } else {
    }
    return
  }
  func.func @transform_0(%arg0: i32, %arg1: i32) -> (i32, i32, i32) {
    %c0_i32 = arith.constant 0 : i32
    %c0_i32_0 = arith.constant 0 : i32
    return %arg0, %c0_i32, %arg1 : i32, i32, i32
  }
  func.func @transform_1(%arg0: i32, %arg1: i32) -> (i32, i32) {
    %c0_i32 = arith.constant 0 : i32
    %c0_i32_0 = arith.constant 0 : i32
    %c0_i32_1 = arith.constant 0 : i32
    return %c0_i32, %c0_i32_0 : i32, i32
  }
  func.func @transform_2(%arg0: i32, %arg1: i32) -> (i32, i32) {
    %c0_i32 = arith.constant 0 : i32
    %c0_i32_0 = arith.constant 0 : i32
    %c0_i32_1 = arith.constant 0 : i32
    return %c0_i32, %c0_i32_0 : i32, i32
  }
  func.func @transform_3(%arg0: i32, %arg1: i32) -> (i32, i32, i32) {
    %c0_i32 = arith.constant 0 : i32
    %c0_i32_0 = arith.constant 0 : i32
    %c0_i32_1 = arith.constant 0 : i32
    return %arg0, %c0_i32, %c0_i32_0 : i32, i32, i32
  }
}

</mosaic_0001>

<bundles_post_ra>
// kernel: tpu_custom_call.1
= control target key start
LH: loop header
LB: loop body
LE: loop exit
PB: predicated region body
PF: predicated region fallthrough
CT: control target
= control target key end

     0   :  { %8 = vsyncpa [#allocation4], 0  ;;  %s1038_s0 = inlined_call_operand.hbm [shape: f32[2,64,256], index: 0, kind: input, shape index: {}]   ;;  %s1039_s1 = inlined_call_operand.vmem [shape: f32[64,4], index: 1, kind: input, shape index: {}]   ;;  %s1040_s2 = inlined_call_operand.vmem [shape: f32[4,64], index: 2, kind: input, shape index: {}]   ;;  %s1041_s3 = inlined_call_operand.hbm [shape: f32[2,1,64], index: 3, kind: output, shape index: {}]  }
   0x1   :  { %10 = vsyncpa [#allocation4 + $0x1], 0 }
   0x2   :  { %11 = vsyncpa [#allocation5], 0 }
   0x3   :  { %13 = vsyncpa [#allocation5 + $0x1], 0  ;;  %s819_s12 = smov 0   ;;  %s821_s13 = smov 0  }
   0x4   :  { %s823_s14 = smov 0   ;;  %s825_s15 = smov 0  }
   0x5   :  { %s827_s16 = smov 0   ;;  %s829_s17 = smov 0  }
   0x6 LB: > { %s552_s18 = sadd.s32 4294967295, %s790_s17   ;;  %s553_s19 = sadd.s32 4294967294, %s790_s17   ;;  %s790_s17 = sphi %s829_s17, %s19_s17   ;;  %s786_s16 = sphi %s827_s16, %s1056_s16   ;;  %s782_s15 = sphi %s825_s15, %s1055_s15   ;;  %s778_s14 = sphi %s823_s14, %s1054_s14   ;;  %s774_s13 = sphi %s821_s13, %s1053_s13   ;;  %s770_s12 = sphi %s819_s12, %s1052_s12  }
   0x7   : > { %s31_s20 = sadd.s32 1, %s786_s16  ;;  %s40_s21 = sadd.s32 1, %s778_s14 }
   0x8   : > { %p33_p0 = scmp.ge.s32.totalorder %s31_s20, 2  ;;  %p47_p1 = scmp.ne.s32.totalorder %s778_s14, %s774_s13 }
   0x9   : > { %p48_p2 = scmp.eq.s32.totalorder %s790_s17, 0  ;;  %p53_p3 = scmp.ne.s32.totalorder %s774_s13, %s770_s12 }
   0xa   : > { %s1058_s20 = smov (%p33_p0, %s31_s20), 0  ;;  %p54_p5 = scmp.eq.s32.totalorder %s552_s18, 0 }
   0xb   : > { %p860_p4 = por %p48_p2, %p47_p1  ;;  %s35_s23 = ssub.s32 %s786_s16, %s1058_s20 }
   0xc   : > { %p119_p6 = scmp.eq.s32.totalorder %s552_s18, 1  ;;  %p38_p7 = scmp.eq.s32.totalorder %s35_s23, 0 }
   0xd   : > { %p866_p8 = por %p54_p5, %p53_p3  ;;  %p125_p10 = scmp.eq.s32.totalorder %s553_s19, 1 }
   0xe   : > { %p870_p9 = por %p119_p6, %p47_p1  ;;  %p619_p13 = scmp.lt.s32.totalorder %s790_s17, 2 }
   0xf   : > { %s875_s26 = scalar_select %p38_p7, %s778_s14, %s40_s21  }
  0x10   : > { %s1045_s25 = scalar_select %p870_p9, 1, 0 }
  0x11   : > { %p877_p11 = por %p125_p10, %p53_p3  ;;  %s151_s28 = sand.u32 1, %s778_s14  }
  0x12   : > { %s556_s29 = sshll.u32 %s151_s28, 7  ;;  %s566_s30 = sshll.u32 %s786_s16, 11 }
  0x13   : > { %s1046_s27 = scalar_select %p877_p11, 1, 0 }
  0x14   : > { %s888_s6 = scalar_lea.hbm %s1038_s0, %s566_s30  ;;  %s155_s7 = scalar_lea.vmem [#allocation3], %s556_s29 }
  0x15   : > { %s164_s8 = sshll.u32 %s155_s7, 4  ;;  %p894_p0 = pnand %p619_p13, %p860_p4  ;;  %s890_s8 = int_to_ptr.vmem [resolvable:$true] %s164_s8 }
  0x16   : > { %s899_s10 = scalar_lea.sflag [#allocation4], %s151_s28  ;;  %s678_s11 = scalar_lea.hbm %s888_s6, 2048 }
  0x17   : > { %p679_p2 = scmp.ne.s32.totalorder %s888_s6, %s678_s11  ;;  %p680_p3 = pneg %p894_p0 }
  0x18   : > { %s683_s21 = scalar_lea.hbm %s1038_s0, 4096  ;;  %p684_p4 = scmp.lt.u32.totalorder %s888_s6, %s1038_s0 }
  0x19   : > { %p681_p5 = pnand %p680_p3, %p679_p2  ;;  %p685_p7 = scmp.lt.u32.totalorder %s683_s21, %s678_s11 }
  0x1a   : > { %p687_p13 = scmp.lt.u32.totalorder %s678_s11, %s888_s6 }
  0x1b   : > { %p682_p6 = pneg %p681_p5  ;;  %p686_p10 = por %p685_p7, %p684_p4 }
  0x1d   : > { %p688_p12 = por %p687_p13, %p686_p10 }
  0x1f   : > { %p689_p1 = pnand %p688_p12, %p682_p6 }
  0x21   : > { %692 = shalt.err (!%p689_p1)
}
  0x22   : > { %s693_s28 = scalar_lea.vmem %s890_s8, 2048  ;;  %s792_s29 = smov [#allocation3]  }
  0x23   : > { %p694_p2 = scmp.ne.s32.totalorder %s890_s8, %s693_s28  ;;  %s698_s30 = sshll.u32 %s792_s29, 4  ;;  %s699_s30 = int_to_ptr.vmem [resolvable:$false] %s698_s30 }
  0x24   : > { %s700_s4 = scalar_lea.vmem %s699_s30, 4096  ;;  %p701_p9 = scmp.lt.s32.totalorder %s890_s8, %s699_s30 }
  0x25   : > { %p696_p5 = pnand %p694_p2, %p680_p3  ;;  %p702_p4 = scmp.lt.s32.totalorder %s700_s4, %s693_s28 }
  0x27   : > { %p697_p11 = pneg %p696_p5  ;;  %p703_p7 = por %p702_p4, %p701_p9 }
  0x29   : > { %p704_p10 = pnand %p703_p7, %p697_p11 }
  0x2b   : > { %707 = shalt.err (!%p704_p10)
}
  0x2c   : > { %s793_s5 = smov 256   ;;  %s794_s7 = smov 16  }
  0x2d   : > { %614 = dma.hbm_to_vmem [thread:$0]  (!%p894_p0), %s888_s6, 2048, %s890_s8, %s899_s10, %s793_s5, %s793_s5, %s794_s7  }
  0x2e   : > { %p172_p12 = scmp.lt.s32.totalorder %s790_s17, 3  ;;  %p1048_p1 = scmp.ge.s32.totalorder %s790_s17, 1 }
  0x30   : > { %p173_p3 = pnand %p1048_p1, %p172_p12 }
  0x31   : > { %s931_s11 = sand.u32 (!%p173_p3), 1, %s774_s13  }
  0x32   : > { %176 = sbr.rel (%p173_p3) target bundleno = 607 (0x25f), region = 32  ;;  %s560_s18 = sshll.u32 (!%p173_p3), %s931_s11, 7 }
  0x33   : > { %s179_s19 = scalar_lea.sflag (!%p173_p3), [#allocation4], %s931_s11  ;;  %s935_s21 = scalar_lea.vmem (!%p173_p3), [#allocation3], %s560_s18 }
  0x39   : > { %761 = dma.done.wait (%p866_p8), %s179_s19, 2048  }
  0x3a   : > { %763 = vsyncadd (%p866_p8), %s179_s19, 4294965248  ;;  %v225_v0 = vld [vmem:[%s935_s21] sm:$0xff]  ;;  %v241_v1 = vld [vmem:[%s935_s21 + $0x8] sm:$0xff]  ;;  %v795_v35 = vmov 0.0|0.0   ;;  %vm796_vm0 = vmmov 0   ;;  %v797_v45 = vmov 0.0   ;;  %v308_v46 = vlaneseq }
  0x3b   : > { %v227_v2 = vld [vmem:[%s935_s21 + $0x20] sm:$0xff]  ;;  %v233_v3 = vmax.f32 %v225_v0, -3.4028235e+38  ;;  %v243_v5 = vld [vmem:[%s935_s21 + $0x28] sm:$0xff]  ;;  %v226_v6 = vld [vmem:[%s935_s21 + $0x10] sm:$0xff]  ;;  %595 = vmatprep.subr.bf16.mxu0 %v795_v35  ;;  %592 = vmatprep.mubr.msk.f32.mxu0 %vm796_vm0, %v797_v45  ;;  %vm319_vm1 = vcmask 130112  }
  0x3c   : > { %v235_v4 = vmax.f32 %v227_v2, -3.4028235e+38  ;;  %v234_v7 = vmax.f32 %v226_v6, -3.4028235e+38  ;;  %v242_v8 = vld [vmem:[%s935_s21 + $0x18] sm:$0xff]  ;;  %v228_v9 = vld [vmem:[%s935_s21 + $0x30] sm:$0xff] }
  0x3d   : > { %v244_v10 = vld [vmem:[%s935_s21 + $0x38] sm:$0xff]  ;;  %v249_v11 = vmax.f32 %v233_v3, %v241_v1  ;;  %v236_v13 = vmax.f32 %v228_v9, -3.4028235e+38  ;;  %v229_v14 = vld [vmem:[%s935_s21 + $0x40] sm:$0xff]  ;;  %v230_v15 = vld [vmem:[%s935_s21 + $0x50] sm:$0xff]  ;;  %v309_v47 = vand.u32 127, %v308_v46 }
  0x3e   : > { %v251_v12 = vmax.f32 %v235_v4, %v243_v5  ;;  %v250_v16 = vmax.f32 %v234_v7, %v242_v8  ;;  %v237_v18 = vmax.f32 %v229_v14, -3.4028235e+38  ;;  %v245_v19 = vld [vmem:[%s935_s21 + $0x48] sm:$0xff]  ;;  %v238_v20 = vmax.f32 %v230_v15, -3.4028235e+38  ;;  %v246_v21 = vld [vmem:[%s935_s21 + $0x58] sm:$0xff] }
  0x3f   : > { %276 = vmax.xlane.f32.xlu0 %v249_v11  ;;  %v252_v17 = vmax.f32 %v236_v13, %v244_v10  ;;  %v231_v22 = vld [vmem:[%s935_s21 + $0x60] sm:$0xff]  ;;  %v232_v23 = vld [vmem:[%s935_s21 + $0x70] sm:$0xff]  ;;  %v247_v28 = vld [vmem:[%s935_s21 + $0x68] sm:$0xff]  ;;  %v311_v48 = vshrl.u32 %v308_v46, 7  ;;  %v314_v49 = vadd.s32 4294967288, %v309_v47  ;;  %v328_v50 = vadd.s32 4294967272, %v309_v47 }
  0x40   : > { %280 = vmax.xlane.f32.xlu1 %v251_v12  ;;  %v253_v24 = vmax.f32 %v237_v18, %v245_v19  ;;  %v254_v25 = vmax.f32 %v238_v20, %v246_v21  ;;  %v239_v26 = vmax.f32 %v231_v22, -3.4028235e+38  ;;  %v240_v27 = vmax.f32 %v232_v23, -3.4028235e+38  ;;  %v248_v29 = vld [vmem:[%s935_s21 + $0x78] sm:$0xff]  ;;  %v292_v32 = vld [vmem:[%s1039_s1] sm:$0xff] }
  0x41   : > { %v293_v33 = vld [vmem:[%s1039_s1 + $0x8] sm:$0xff]  ;;  %v294_v36 = vld [vmem:[%s1039_s1 + $0x10] sm:$0xff]  ;;  %v295_v37 = vld [vmem:[%s1039_s1 + $0x18] sm:$0xff]  ;;  %v321_v51 = vadd.s32 4294967280, %v309_v47  ;;  %v335_v54 = vadd.s32 4294967264, %v309_v47  ;;  %v312_v55 = vsub.s32 %v309_v47, %v311_v48  ;;  %v317_v56 = vsub.s32 %v314_v49, %v311_v48  ;;  %s563_s8 = sshll.u32 %s782_s15, 4 }
  0x42   : > { %v255_v30 = vmax.f32 %v239_v26, %v247_v28  ;;  %v256_v31 = vmax.f32 %v240_v27, %v248_v29  ;;  %v596_v34 = vpack.c.bf16 %v293_v33, %v292_v32  ;;  %v599_v38 = vpack.c.bf16 %v295_v37, %v294_v36  ;;  %v296_v39 = vld [vmem:[%s1039_s1 + $0x20] sm:$0xff]  ;;  %v297_v40 = vld [vmem:[%s1039_s1 + $0x28] sm:$0xff]  ;;  %v298_v42 = vld [vmem:[%s1039_s1 + $0x30] sm:$0xff]  ;;  %s203_s9 = scalar_lea.vmem [#allocation6], %s931_s11  ;;  %s989_s28 = scalar_lea.hbm %s1041_s3, %s563_s8 }
  0x43   : > { %278 = vmax.xlane.f32.xlu0 %v250_v16  ;;  %v602_v41 = vpack.c.bf16 %v297_v40, %v296_v39  ;;  %v299_v43 = vld [vmem:[%s1039_s1 + $0x38] sm:$0xff]  ;;  %v331_v57 = vsub.s32 %v328_v50, %v311_v48  ;;  %v324_v58 = vsub.s32 %v321_v51, %v311_v48  ;;  %v342_v59 = vadd.s32 4294967256, %v309_v47  ;;  %v437_v28 = vld [vmem:[%s1040_s2] sm:$0xf]  ;;  %s475_s10 = sshll.u32 %s203_s9, 4  ;;  %s463_s29 = scalar_lea.sflag [#allocation5], %s931_s11  ;;  %s991_s10 = int_to_ptr.vmem [resolvable:$true] %s475_s10 }
  0x44   : > { %282 = vmax.xlane.f32.xlu1 %v252_v17  ;;  %597 = vmatpush3.bf16.msra.mxu0 %v596_v34  ;;  %v605_v44 = vpack.c.bf16 %v299_v43, %v298_v42  ;;  %vm326_vm2 = vcmask 195712   ;;  %v338_v62 = vsub.s32 %v335_v54, %v311_v48  ;;  %v349_v63 = vadd.s32 4294967248, %v309_v47  ;;  %s708_s30 = scalar_lea.vmem %s991_s10, 16  ;;  %p1049_p9 = scmp.ne.s32.totalorder %s1045_s25, 0 }
  0x45   : > { %598 = vmatprep.subr.bf16.mxu0 %v795_v35  ;;  %v356_v3 = vadd.s32 4294967240, %v309_v47  ;;  %vm333_vm3 = vcmask 261312   ;;  %v345_v5 = vsub.s32 %v342_v59, %v311_v48  ;;  %vm340_vm4 = vcmask 326912   ;;  %p709_p8 = scmp.ne.s32.totalorder %s991_s10, %s708_s30  ;;  %s798_s15 = smov [#allocation6]  }
  0x46   : > { %v352_v12 = vsub.s32 %v349_v63, %v311_v48  ;;  %vm347_vm5 = vcmask 392512   ;;  %vm354_vm6 = vcmask 458112   ;;  %vm361_vm7 = vcmask 523712   ;;  %s712_s4 = sshll.u32 %s798_s15, 4  ;;  %s713_s4 = int_to_ptr.vmem [resolvable:$false] %s712_s4 }
  0x47   : > { %284 = vmax.xlane.f32.xlu0 %v253_v24  ;;  %v359_v13 = vsub.s32 %v356_v3, %v311_v48  ;;  %vm363_vm8 = vcmask 523264   ;;  %v440_v23 = vsub.s32 0, %v311_v48  ;;  %vm446_vm9 = vcmask 519168   ;;  %p710_p11 = pnand %p709_p8, %p1049_p9  ;;  %s714_s5 = scalar_lea.vmem %s713_s4, 32 }
  0x48   : > { %286 = vmax.xlane.f32.xlu1 %v254_v25  ;;  %600 = vmatpush3.bf16.msra.mxu0 %v599_v38  ;;  %vm460_vm10 = vcmask 516096   ;;  %p715_p6 = scmp.lt.s32.totalorder %s991_s10, %s713_s4  ;;  %p716_p13 = scmp.lt.s32.totalorder %s714_s5, %s708_s30 }
  0x49   : > { %601 = vmatprep.subr.bf16.mxu0 %v795_v35  ;;  %p711_p0 = pneg %p710_p11 }
  0x4a   : > { %p717_p2 = por %p716_p13, %p715_p6 }
  0x4b   : > { %288 = vmax.xlane.f32.xlu0 %v255_v30 }
  0x4c   : > { %290 = vmax.xlane.f32.xlu1 %v256_v31  ;;  %603 = vmatpush3.bf16.msra.mxu0 %v602_v41  ;;  %p718_p5 = pnand %p717_p2, %p711_p0 }
  0x4d   : > { %604 = vmatprep.subr.bf16.mxu0 %v795_v35 }
  0x50   : > { %606 = vmatpush3.bf16.msra.mxu0 %v605_v44 }
  0xcc   : > { %v277_v52 = vpop.xlane.xlu0 %276 }
  0xcd   : > { %v281_v53 = vpop.xlane.xlu1 %280  ;;  %v313_v0 = vrot.slane %v277_v52, %v312_v55 }
  0xce   : > { %v325_v4 = vrot.slane %v281_v53, %v324_v58 }
  0xd0   : > { %v279_v60 = vpop.xlane.xlu0 %278 }
  0xd1   : > { %v283_v61 = vpop.xlane.xlu1 %282  ;;  %v318_v1 = vrot.slane %v279_v60, %v317_v56 }
  0xd2   : > { %v332_v2 = vrot.slane %v283_v61, %v331_v57 }
  0xd3   : > { %v320_v6 = vsel %vm319_vm1, %v318_v1, %v313_v0 }
  0xd4   : > { %v327_v7 = vsel %vm326_vm2, %v325_v4, %v320_v6  ;;  %v285_v8 = vpop.xlane.xlu0 %284 }
  0xd5   : > { %v287_v9 = vpop.xlane.xlu1 %286  ;;  %v334_v10 = vsel %vm333_vm3, %v332_v2, %v327_v7  ;;  %v339_v11 = vrot.slane %v285_v8, %v338_v62 }
  0xd6   : > { %v346_v14 = vrot.slane %v287_v9, %v345_v5 }
  0xd7   : > { %v341_v15 = vsel %vm340_vm4, %v339_v11, %v334_v10 }
  0xd8   : > { %v289_v16 = vpop.xlane.xlu0 %288  ;;  %v348_v20 = vsel %vm347_vm5, %v346_v14, %v341_v15 }
  0xd9   : > { %v291_v17 = vpop.xlane.xlu1 %290  ;;  %v353_v18 = vrot.slane %v289_v16, %v352_v12 }
  0xda   : > { %v360_v19 = vrot.slane %v291_v17, %v359_v13 }
  0xdb   : > { %v355_v21 = vsel %vm354_vm6, %v353_v18, %v348_v20 }
  0xdc   : > { %v362_v22 = vsel %vm361_vm7, %v360_v19, %v355_v21 }
  0xdd   : > { %593 = vmatmul.mubr.msk.f32.vlgmr.msra.gmra.mrb[0].mxu0 %vm363_vm8, %v362_v22 }
 0x1b0   : > { %v432_v24 = vpop.f32.mrb[0].mxu0 }
 0x1b1   : > { %v436_v25 = vmax.f32 %v432_v24, 0.0  ;;  %v594_v26 = vpop.f32.mrb[1].mxu0 }
 0x1b3   : > { %v441_v27 = vrot.slane %v436_v25, %v440_v23 }
 0x1b5   : > { %443 = vbcast.lane.b32.xlu0 %v441_v27, 256 }
 0x227   : > { %v444_v29 = vpop.permute.xlu0 %443 }
 0x228   : > { %v445_v30 = vmul.f32 %v444_v29, %v437_v28 }
 0x22a   : > { %v447_v31 = vsel %vm446_vm9, %v445_v30, 0.0 }
 0x22b   : > { %v448_v32 = vrot.slane %v447_v31, 4 }
 0x22d   : > { %v449_v33 = vadd.f32 %v448_v32, %v447_v31 }
 0x22f   : > { %v450_v34 = vrot.slane %v449_v33, 2 }
 0x231   : > { %v451_v35 = vadd.f32 %v450_v34, %v449_v33 }
 0x233   : > { %v452_v36 = vrot.slane %v451_v35, 1 }
 0x235   : > { %v453_v37 = vadd.f32 %v452_v36, %v451_v35 }
 0x237   : > { %v562_v38 = vmul.f32 -1.442695, %v453_v37 }
 0x239   : > { %674 = vpow2.f32 %v562_v38 }
 0x243   : > { %v675_v39 = vpop.eup %674 }
 0x244   : > { %v457_v40 = vadd.f32 1.0, %v675_v39 }
 0x246   : > { %676 = vrcp.f32 %v457_v40 }
 0x250   : > { %v677_v41 = vpop.eup %676 }
 0x251   : > { %461 = vst.msk [vmem:[%s203_s9] sm:$0x1] %vm460_vm10, %v677_v41 }
 0x252   : > { %721 = shalt.err (!%p718_p5)
}
 0x253   : > { %s722_s11 = scalar_lea.hbm %s989_s28, 16  ;;  %s726_s19 = scalar_lea.hbm %s1041_s3, 32 }
 0x254   : > { %p723_p4 = scmp.ne.s32.totalorder %s989_s28, %s722_s11  ;;  %p727_p12 = scmp.lt.u32.totalorder %s989_s28, %s1041_s3 }
 0x255   : > { %p728_p1 = scmp.lt.u32.totalorder %s726_s19, %s722_s11  ;;  %p730_p8 = scmp.lt.u32.totalorder %s722_s11, %s989_s28 }
 0x256   : > { %p724_p7 = pnand %p723_p4, %p1049_p9 }
 0x257   : > { %p729_p3 = por %p728_p1, %p727_p12 }
 0x258   : > { %p725_p10 = pneg %p724_p7 }
 0x259   : > { %p731_p11 = por %p730_p8, %p729_p3 }
 0x25b   : > { %p732_p0 = pnand %p731_p11, %p725_p10 }
 0x25d   : > { %735 = shalt.err (!%p732_p0)
}
 0x25e   : > { %609 = dma.vmem_to_hbm [thread:$0]  (%p1049_p9), %s991_s10, 16, %s989_s28, %s463_s29  }
 0x25f PF: > { %s487_s6 = sand.u32 1, %s770_s12   ;;  %p1050_p6 = scmp.ne.s32.totalorder %s1046_s27, 0 }
 0x260   : > { %p1051_p13 = scmp.ge.s32.totalorder %s790_s17, 2  ;;  %s488_s8 = scalar_lea.sflag [#allocation5], %s487_s6 }
 0x262   : > { %p616_p2 = pnand %p1051_p13, %p1050_p6 }
 0x264   : > { %765 = dma.done.wait (!%p616_p2), %s488_s8, 16  }
 0x265   : > { %767 = vsyncadd (!%p616_p2), %s488_s8, 4294967280  ;;  %s19_s17 = sadd.s32 1, %s790_s17   ;;  %s1052_s12 = smov %s774_s13 }
 0x266   : > { %p16_p5 = scmp.ge.s32.totalorder %s19_s17, 4   ;;  %s1053_s13 = smov %s778_s14 }
 0x267   : > { %s1054_s14 = smov %s875_s26  ;;  %s1055_s15 = smov %s786_s16 }
 0x268   : > { %s1056_s16 = smov %s1058_s20  ;;  %18 = sbr.rel (!%p16_p5) target bundleno = 6 (0x6), region = 85 }
 0x26f   :  { %492 = vsyncpa [#allocation4], 1 }
 0x270   :  { %494 = vsyncpa [#allocation4 + $0x1], 1 }
 0x271   :  { %495 = vsyncpa [#allocation5], 1 }
 0x272   :  { %497 = vsyncpa [#allocation5 + $0x1], 1 }

</bundles_post_ra>
